<compile_context>
chip_gen: v5e
topology: v5e:2x2
jax: 0.10.0
libtpu: 0.0.40
codegen_flags: <defaults>
</compile_context>

<pallas_src>
import functools

import jax
import jax.numpy as jnp
from jax import lax
from jax.experimental import pallas as pl
from jax.experimental.pallas import tpu as pltpu


def _make_kernel(K, P, W, Cin, Cout, HW, margin, marginL):
    KK = K * K

    def kernel(x_ref, wdw_ref, b1_ref, m_ref, wpw_ref, b2_ref, o_ref, *scratch):
        # x_ref : (Cin, HW)            flattened input for one batch element
        # wdw   : (Cin, K*K)           depthwise taps (BN1 scale folded in)
        # b1    : (Cin, 1)             folded BN1 shift (conv1 bias folded in)
        # m     : (K*K, HW)            per-tap validity masks (0/1, f32)
        # wpw   : (Cout, Cin)          pointwise weights (BN2 scale folded in)
        # b2    : (Cout, 1)            folded BN2 shift (conv2 bias folded in)
        # o_ref : (Cout, HW)
        wdw = wdw_ref[...]                         # (Cin, KK)
        m_all = m_ref[...]                         # (KK, HW)

        if margin > 0:
            xf_ref = scratch[0]
            # Zero-filled, lane-aligned staging buffer: every depthwise tap is
            # then a plain constant-offset window read on the lane axis.
            xf_ref[...] = jnp.zeros_like(xf_ref)
            xf_ref[:, marginL:marginL + HW] = x_ref[...]

            def patch(off):
                return xf_ref[:, marginL + off: marginL + off + HW].astype(
                    jnp.float32)
        else:
            x = x_ref[...].astype(jnp.float32)

            def patch(off):
                return x

        # ---- depthwise KxK conv (stride 1, 'same') on the flattened axis ----
        acc = jnp.zeros((Cin, HW), jnp.float32)
        for t in range(KK):
            kh, kw = t // K, t % K
            dh, dw = kh - P, kw - P
            p = patch(dh * W + dw)
            if dh != 0 or dw != 0:
                p = p * m_all[t:t + 1, :]          # kill out-of-image taps
            acc = acc + wdw[:, t:t + 1] * p

        # ---- BN1 shift (scale already in wdw) + ReLU ----
        y = jnp.maximum(acc + b1_ref[...], 0.0)    # (Cin, HW)

        # ---- 1x1 pointwise conv (BN2 scale already in wpw) ----
        wpw = wpw_ref[...].astype(jnp.float32)     # (Cout, Cin)
        if Cin <= 16:
            # Tiny contraction: VPU broadcast-MACs avoid MXU push/pop latency.
            out = jnp.zeros((Cout, HW), jnp.float32)
            for ci in range(Cin):
                out = out + wpw[:, ci:ci + 1] * y[ci:ci + 1, :]
        else:
            out = jnp.dot(wpw, y, preferred_element_type=jnp.float32)

        # ---- BN2 shift + ReLU, lane-dense store ----
        out = jnp.maximum(out + b2_ref[...], 0.0)
        o_ref[...] = out.astype(o_ref.dtype)

    return kernel


def basic_dwconv_pallas(x_nchw, params, *, kernel_size=1, stride=1, padding=0,
                        eps=1e-5):
    """Runs BasicDWConv.forward. x_nchw: (N, Cin, H, W). Returns NCHW output."""
    (w_dw, b_dw, g1, be1, m1, v1, w_pw, b_pw, g2, be2, m2, v2) = params

    N, Cin, H, W = x_nchw.shape
    K, S, P = kernel_size, stride, padding
    Cout = w_pw.shape[0]
    Hout = (H + 2 * P - K) // S + 1
    Wout = (W + 2 * P - K) // S + 1
    if S != 1 or Hout != H or Wout != W:
        # TODO(synk): strided / non-'same' depthwise needs a spatially blocked
        # variant; the fused flat-layout kernel covers stride=1, K == 2P+1.
        raise NotImplementedError(
            "fused kernel supports stride=1 'same' depthwise configs only")

    HW = H * W
    KK = K * K

    # ---- fold BN (inference mode) + conv biases into weights / shifts ----
    s1 = g1 / jnp.sqrt(v1 + eps)
    wdw = (w_dw[:, 0, :, :].reshape(Cin, KK) * s1[:, None]).astype(jnp.float32)
    b1 = ((b_dw - m1) * s1 + be1).reshape(Cin, 1).astype(jnp.float32)
    s2 = g2 / jnp.sqrt(v2 + eps)
    wpw = (w_pw[:, :, 0, 0] * s2[:, None]).astype(jnp.float32)
    b2 = ((b_pw - m2) * s2 + be2).reshape(Cout, 1).astype(jnp.float32)

    # ---- per-tap validity masks over the flattened (H*W) spatial axis ----
    rows = jnp.arange(H, dtype=jnp.int32)
    cols = jnp.arange(W, dtype=jnp.int32)
    masks = []
    for kh in range(K):
        for kw in range(K):
            dh, dw = kh - P, kw - P
            rok = (rows + dh >= 0) & (rows + dh < H)
            cok = (cols + dw >= 0) & (cols + dw < W)
            masks.append((rok[:, None] & cok[None, :]).reshape(HW))
    masks = jnp.stack(masks, axis=0).astype(jnp.float32)        # (KK, HW)

    # NCHW -> (N, Cin, H*W): contiguous minor-dim merge, no HBM pass.
    x = x_nchw.reshape(N, Cin, HW)

    margin = P * W + P                                # max |flat tap offset|
    marginL = ((margin + 127) // 128) * 128 if margin > 0 else 0

    kernel = _make_kernel(K, P, W, Cin, Cout, HW, margin, marginL)

    scratch_shapes = []
    if margin > 0:
        scratch_shapes.append(pltpu.VMEM((Cin, marginL + HW + margin), x.dtype))

    out_flat = pl.pallas_call(
        kernel,
        out_shape=jax.ShapeDtypeStruct((N, Cout, HW), jnp.float32),
        grid_spec=pltpu.PrefetchScalarGridSpec(
            num_scalar_prefetch=0,
            grid=(N,),
            in_specs=[
                pl.BlockSpec((None, Cin, HW), lambda n: (n, 0, 0)),
                pl.BlockSpec((Cin, KK), lambda n: (0, 0)),
                pl.BlockSpec((Cin, 1), lambda n: (0, 0)),
                pl.BlockSpec((KK, HW), lambda n: (0, 0)),
                pl.BlockSpec((Cout, Cin), lambda n: (0, 0)),
                pl.BlockSpec((Cout, 1), lambda n: (0, 0)),
            ],
            out_specs=pl.BlockSpec((None, Cout, HW), lambda n: (n, 0, 0)),
            scratch_shapes=scratch_shapes,
        ),
        compiler_params=pltpu.CompilerParams(
            dimension_semantics=("parallel",)),
    )(x, wdw, b1, masks, wpw, b2)

    # (N, Cout, H*W) -> NCHW: free minor-dim split, no transpose.
    return out_flat.reshape(N, Cout, H, W)


def basic_dwconv_ref(x_nchw, params, *, kernel_size=1, stride=1, padding=0,
                     eps=1e-5):
    """Pure-JAX reference (lax.conv), NCHW throughout."""
    (w_dw, b_dw, g1, be1, m1, v1, w_pw, b_pw, g2, be2, m2, v2) = params
    Cin = x_nchw.shape[1]

    out = lax.conv_general_dilated(
        x_nchw, w_dw, window_strides=(stride, stride),
        padding=[(padding, padding), (padding, padding)],
        dimension_numbers=("NCHW", "OIHW", "NCHW"),
        feature_group_count=Cin)
    out = out + b_dw[None, :, None, None]
    out = (out - m1[None, :, None, None]) / jnp.sqrt(v1 + eps)[None, :, None, None]
    out = out * g1[None, :, None, None] + be1[None, :, None, None]
    out = jnp.maximum(out, 0.0)

    out = lax.conv_general_dilated(
        out, w_pw, window_strides=(1, 1), padding=[(0, 0), (0, 0)],
        dimension_numbers=("NCHW", "OIHW", "NCHW"))
    out = out + b_pw[None, :, None, None]
    out = (out - m2[None, :, None, None]) / jnp.sqrt(v2 + eps)[None, :, None, None]
    out = out * g2[None, :, None, None] + be2[None, :, None, None]
    return jnp.maximum(out, 0.0)


def make_params(key, in_channels, out_channels, kernel_size):
    ks = jax.random.split(key, 8)
    Cin, Cout, K = in_channels, out_channels, kernel_size
    # conv1: depthwise, weight (Cin, 1, K, K), bias (Cin,)
    w_dw = jax.random.normal(ks[0], (Cin, 1, K, K), jnp.float32) * 0.2
    b_dw = jax.random.normal(ks[1], (Cin,), jnp.float32) * 0.1
    # bn1
    g1 = 1.0 + 0.1 * jax.random.normal(ks[2], (Cin,), jnp.float32)
    be1 = 0.1 * jax.random.normal(ks[3], (Cin,), jnp.float32)
    m1 = 0.05 * jax.random.normal(ks[4], (Cin,), jnp.float32)
    v1 = 1.0 + 0.1 * jnp.abs(jax.random.normal(ks[5], (Cin,), jnp.float32))
    # conv2: pointwise, weight (Cout, Cin, 1, 1), bias (Cout,)
    w_pw = jax.random.normal(ks[6], (Cout, Cin, 1, 1), jnp.float32) * 0.2
    b_pw = jax.random.normal(ks[7], (Cout,), jnp.float32) * 0.1
    # bn2
    g2 = 1.0 + 0.05 * jnp.cos(jnp.arange(Cout, dtype=jnp.float32))
    be2 = 0.05 * jnp.sin(jnp.arange(Cout, dtype=jnp.float32))
    m2 = 0.02 * jnp.cos(1.0 + jnp.arange(Cout, dtype=jnp.float32))
    v2 = 1.0 + 0.1 * jnp.abs(jnp.sin(2.0 + jnp.arange(Cout, dtype=jnp.float32)))
    return (w_dw, b_dw, g1, be1, m1, v1, w_pw, b_pw, g2, be2, m2, v2)


if __name__ == "__main__":
    # Small, module-consistent shapes: batch=2, in_channels=4, out_channels=8,
    # spatial 16x16, depthwise 3x3, stride 1, padding 1.
    N, Cin, Cout, H, W = 2, 4, 8, 16, 16
    K, S, P = 3, 1, 1

    key = jax.random.PRNGKey(0)
    kx, kp = jax.random.split(key)
    x = jax.random.normal(kx, (N, Cin, H, W), jnp.float32)
    params = make_params(kp, Cin, Cout, K)

    run = jax.jit(functools.partial(
        basic_dwconv_pallas, kernel_size=K, stride=S, padding=P))
    out = run(x, params)
    out = jax.block_until_ready(out)

    ref = basic_dwconv_ref(x, params, kernel_size=K, stride=S, padding=P)
    ref = jax.block_until_ready(ref)

    assert out.shape == ref.shape == (N, Cout, H, W), (out.shape, ref.shape)
    assert jnp.allclose(out, ref, atol=1e-4, rtol=1e-4), float(
        jnp.max(jnp.abs(out - ref)))

    print("KERNEL_OK")
</pallas_src>

<mosaic_0001>
module attributes {stable_mosaic.version = 11 : i64} {
  func.func @kernel(%arg0: i32, %arg1: memref<1x4x256xf32, #tpu.memory_space<vmem>>, %arg2: memref<4x9xf32, #tpu.memory_space<vmem>>, %arg3: memref<4x1xf32, #tpu.memory_space<vmem>>, %arg4: memref<9x256xf32, #tpu.memory_space<vmem>>, %arg5: memref<8x4xf32, #tpu.memory_space<vmem>>, %arg6: memref<8x1xf32, #tpu.memory_space<vmem>>, %arg7: memref<1x8x256xf32, #tpu.memory_space<vmem>>, %arg8: memref<4x401xf32, #tpu.memory_space<vmem>>) attributes {dimension_semantics = [#tpu.dimension_semantics<parallel>], iteration_bounds = array<i64: 2>, scalar_prefetch = 0 : i64, scratch_operands = 1 : i64, tpu.core_type = #tpu.core_type<tc>, window_params = [{transform_indices = @transform_0, window_bounds = array<i64: 1, 4, 256>}, {pipeline_mode = #tpu.pipeline_mode<synchronous>, transform_indices = @transform_1, window_bounds = array<i64: 4, 9>}, {pipeline_mode = #tpu.pipeline_mode<synchronous>, transform_indices = @transform_2, window_bounds = array<i64: 4, 1>}, {pipeline_mode = #tpu.pipeline_mode<synchronous>, transform_indices = @transform_3, window_bounds = array<i64: 9, 256>}, {pipeline_mode = #tpu.pipeline_mode<synchronous>, transform_indices = @transform_4, window_bounds = array<i64: 8, 4>}, {pipeline_mode = #tpu.pipeline_mode<synchronous>, transform_indices = @transform_5, window_bounds = array<i64: 8, 1>}, {transform_indices = @transform_6, window_bounds = array<i64: 1, 8, 256>}]} {
    %c0 = arith.constant 0 : index
    %c0_0 = arith.constant 0 : index
    %0 = vector.load %arg2[%c0, %c0_0] : memref<4x9xf32, #tpu.memory_space<vmem>>, vector<4x9xf32>
    %c0_1 = arith.constant 0 : index
    %c0_2 = arith.constant 0 : index
    %1 = vector.load %arg4[%c0_1, %c0_2] : memref<9x256xf32, #tpu.memory_space<vmem>>, vector<9x256xf32>
    %cst = arith.constant 0.000000e+00 : f32
    %2 = vector.broadcast %cst : f32 to vector<4x401xf32>
    %c0_3 = arith.constant 0 : index
    %c0_4 = arith.constant 0 : index
    %3 = vector.load %arg8[%c0_3, %c0_4] : memref<4x401xf32, #tpu.memory_space<vmem>>, vector<4x401xf32>
    tpu.vector_store %arg8[%c0_3, %c0_4], %2 {strides = array<i32>} : memref<4x401xf32, #tpu.memory_space<vmem>>, vector<4x401xf32>,
    %c0_5 = arith.constant 0 : index
    %c0_6 = arith.constant 0 : index
    %c0_7 = arith.constant 0 : index
    %4 = vector.load %arg1[%c0_5, %c0_6, %c0_7] : memref<1x4x256xf32, #tpu.memory_space<vmem>>, vector<1x4x256xf32>
    %5 = vector.shape_cast %4 : vector<1x4x256xf32> to vector<4x256xf32>
    %c0_8 = arith.constant 0 : index
    %c128 = arith.constant 128 : index
    %6 = vector.load %arg8[%c0_8, %c128] : memref<4x401xf32, #tpu.memory_space<vmem>>, vector<4x256xf32>
    tpu.vector_store %arg8[%c0_8, %c128], %5 {strides = array<i32>} : memref<4x401xf32, #tpu.memory_space<vmem>>, vector<4x256xf32>,
    %cst_9 = arith.constant 0.000000e+00 : f32
    %7 = vector.broadcast %cst_9 : f32 to vector<4x256xf32>
    %c0_10 = arith.constant 0 : index
    %c111 = arith.constant 111 : index
    %8 = vector.load %arg8[%c0_10, %c111] : memref<4x401xf32, #tpu.memory_space<vmem>>, vector<4x256xf32>
    %9 = vector.extract_strided_slice %1 {offsets = [0, 0], sizes = [1, 256], strides = [1, 1]} : vector<9x256xf32> to vector<1x256xf32>
    %10 = vector.broadcast %9 : vector<1x256xf32> to vector<4x256xf32>
    %11 = arith.mulf %8, %10 : vector<4x256xf32>
    %12 = vector.extract_strided_slice %0 {offsets = [0, 0], sizes = [4, 1], strides = [1, 1]} : vector<4x9xf32> to vector<4x1xf32>
    %13 = vector.broadcast %12 : vector<4x1xf32> to vector<4x256xf32>
    %14 = arith.mulf %13, %11 : vector<4x256xf32>
    %15 = arith.addf %7, %14 : vector<4x256xf32>
    %c0_11 = arith.constant 0 : index
    %c112 = arith.constant 112 : index
    %16 = vector.load %arg8[%c0_11, %c112] : memref<4x401xf32, #tpu.memory_space<vmem>>, vector<4x256xf32>
    %17 = vector.extract_strided_slice %1 {offsets = [1, 0], sizes = [1, 256], strides = [1, 1]} : vector<9x256xf32> to vector<1x256xf32>
    %18 = vector.broadcast %17 : vector<1x256xf32> to vector<4x256xf32>
    %19 = arith.mulf %16, %18 : vector<4x256xf32>
    %20 = vector.extract_strided_slice %0 {offsets = [0, 1], sizes = [4, 1], strides = [1, 1]} : vector<4x9xf32> to vector<4x1xf32>
    %21 = vector.broadcast %20 : vector<4x1xf32> to vector<4x256xf32>
    %22 = arith.mulf %21, %19 : vector<4x256xf32>
    %23 = arith.addf %15, %22 : vector<4x256xf32>
    %c0_12 = arith.constant 0 : index
    %c113 = arith.constant 113 : index
    %24 = vector.load %arg8[%c0_12, %c113] : memref<4x401xf32, #tpu.memory_space<vmem>>, vector<4x256xf32>
    %25 = vector.extract_strided_slice %1 {offsets = [2, 0], sizes = [1, 256], strides = [1, 1]} : vector<9x256xf32> to vector<1x256xf32>
    %26 = vector.broadcast %25 : vector<1x256xf32> to vector<4x256xf32>
    %27 = arith.mulf %24, %26 : vector<4x256xf32>
    %28 = vector.extract_strided_slice %0 {offsets = [0, 2], sizes = [4, 1], strides = [1, 1]} : vector<4x9xf32> to vector<4x1xf32>
    %29 = vector.broadcast %28 : vector<4x1xf32> to vector<4x256xf32>
    %30 = arith.mulf %29, %27 : vector<4x256xf32>
    %31 = arith.addf %23, %30 : vector<4x256xf32>
    %c0_13 = arith.constant 0 : index
    %c127 = arith.constant 127 : index
    %32 = vector.load %arg8[%c0_13, %c127] : memref<4x401xf32, #tpu.memory_space<vmem>>, vector<4x256xf32>
    %33 = vector.extract_strided_slice %1 {offsets = [3, 0], sizes = [1, 256], strides = [1, 1]} : vector<9x256xf32> to vector<1x256xf32>
    %34 = vector.broadcast %33 : vector<1x256xf32> to vector<4x256xf32>
    %35 = arith.mulf %32, %34 : vector<4x256xf32>
    %36 = vector.extract_strided_slice %0 {offsets = [0, 3], sizes = [4, 1], strides = [1, 1]} : vector<4x9xf32> to vector<4x1xf32>
    %37 = vector.broadcast %36 : vector<4x1xf32> to vector<4x256xf32>
    %38 = arith.mulf %37, %35 : vector<4x256xf32>
    %39 = arith.addf %31, %38 : vector<4x256xf32>
    %c0_14 = arith.constant 0 : index
    %c128_15 = arith.constant 128 : index
    %40 = vector.load %arg8[%c0_14, %c128_15] : memref<4x401xf32, #tpu.memory_space<vmem>>, vector<4x256xf32>
    %41 = vector.extract_strided_slice %0 {offsets = [0, 4], sizes = [4, 1], strides = [1, 1]} : vector<4x9xf32> to vector<4x1xf32>
    %42 = vector.broadcast %41 : vector<4x1xf32> to vector<4x256xf32>
    %43 = arith.mulf %42, %40 : vector<4x256xf32>
    %44 = arith.addf %39, %43 : vector<4x256xf32>
    %c0_16 = arith.constant 0 : index
    %c129 = arith.constant 129 : index
    %45 = vector.load %arg8[%c0_16, %c129] : memref<4x401xf32, #tpu.memory_space<vmem>>, vector<4x256xf32>
    %46 = vector.extract_strided_slice %1 {offsets = [5, 0], sizes = [1, 256], strides = [1, 1]} : vector<9x256xf32> to vector<1x256xf32>
    %47 = vector.broadcast %46 : vector<1x256xf32> to vector<4x256xf32>
    %48 = arith.mulf %45, %47 : vector<4x256xf32>
    %49 = vector.extract_strided_slice %0 {offsets = [0, 5], sizes = [4, 1], strides = [1, 1]} : vector<4x9xf32> to vector<4x1xf32>
    %50 = vector.broadcast %49 : vector<4x1xf32> to vector<4x256xf32>
    %51 = arith.mulf %50, %48 : vector<4x256xf32>
    %52 = arith.addf %44, %51 : vector<4x256xf32>
    %c0_17 = arith.constant 0 : index
    %c143 = arith.constant 143 : index
    %53 = vector.load %arg8[%c0_17, %c143] : memref<4x401xf32, #tpu.memory_space<vmem>>, vector<4x256xf32>
    %54 = vector.extract_strided_slice %1 {offsets = [6, 0], sizes = [1, 256], strides = [1, 1]} : vector<9x256xf32> to vector<1x256xf32>
    %55 = vector.broadcast %54 : vector<1x256xf32> to vector<4x256xf32>
    %56 = arith.mulf %53, %55 : vector<4x256xf32>
    %57 = vector.extract_strided_slice %0 {offsets = [0, 6], sizes = [4, 1], strides = [1, 1]} : vector<4x9xf32> to vector<4x1xf32>
    %58 = vector.broadcast %57 : vector<4x1xf32> to vector<4x256xf32>
    %59 = arith.mulf %58, %56 : vector<4x256xf32>
    %60 = arith.addf %52, %59 : vector<4x256xf32>
    %c0_18 = arith.constant 0 : index
    %c144 = arith.constant 144 : index
    %61 = vector.load %arg8[%c0_18, %c144] : memref<4x401xf32, #tpu.memory_space<vmem>>, vector<4x256xf32>
    %62 = vector.extract_strided_slice %1 {offsets = [7, 0], sizes = [1, 256], strides = [1, 1]} : vector<9x256xf32> to vector<1x256xf32>
    %63 = vector.broadcast %62 : vector<1x256xf32> to vector<4x256xf32>
    %64 = arith.mulf %61, %63 : vector<4x256xf32>
    %65 = vector.extract_strided_slice %0 {offsets = [0, 7], sizes = [4, 1], strides = [1, 1]} : vector<4x9xf32> to vector<4x1xf32>
    %66 = vector.broadcast %65 : vector<4x1xf32> to vector<4x256xf32>
    %67 = arith.mulf %66, %64 : vector<4x256xf32>
    %68 = arith.addf %60, %67 : vector<4x256xf32>
    %c0_19 = arith.constant 0 : index
    %c145 = arith.constant 145 : index
    %69 = vector.load %arg8[%c0_19, %c145] : memref<4x401xf32, #tpu.memory_space<vmem>>, vector<4x256xf32>
    %70 = vector.extract_strided_slice %1 {offsets = [8, 0], sizes = [1, 256], strides = [1, 1]} : vector<9x256xf32> to vector<1x256xf32>
    %71 = vector.broadcast %70 : vector<1x256xf32> to vector<4x256xf32>
    %72 = arith.mulf %69, %71 : vector<4x256xf32>
    %73 = vector.extract_strided_slice %0 {offsets = [0, 8], sizes = [4, 1], strides = [1, 1]} : vector<4x9xf32> to vector<4x1xf32>
    %74 = vector.broadcast %73 : vector<4x1xf32> to vector<4x256xf32>
    %75 = arith.mulf %74, %72 : vector<4x256xf32>
    %76 = arith.addf %68, %75 : vector<4x256xf32>
    %c0_20 = arith.constant 0 : index
    %c0_21 = arith.constant 0 : index
    %77 = vector.load %arg3[%c0_20, %c0_21] : memref<4x1xf32, #tpu.memory_space<vmem>>, vector<4x1xf32>
    %78 = vector.broadcast %77 : vector<4x1xf32> to vector<4x256xf32>
    %79 = arith.addf %76, %78 : vector<4x256xf32>
    %cst_22 = arith.constant 0.000000e+00 : f32
    %80 = vector.broadcast %cst_22 : f32 to vector<4x256xf32>
    %81 = arith.maximumf %79, %80 : vector<4x256xf32>
    %c0_23 = arith.constant 0 : index
    %c0_24 = arith.constant 0 : index
    %82 = vector.load %arg5[%c0_23, %c0_24] : memref<8x4xf32, #tpu.memory_space<vmem>>, vector<8x4xf32>
    %cst_25 = arith.constant 0.000000e+00 : f32
    %83 = vector.broadcast %cst_25 : f32 to vector<8x256xf32>
    %84 = vector.extract_strided_slice %82 {offsets = [0, 0], sizes = [8, 1], strides = [1, 1]} : vector<8x4xf32> to vector<8x1xf32>
    %85 = vector.extract_strided_slice %81 {offsets = [0, 0], sizes = [1, 256], strides = [1, 1]} : vector<4x256xf32> to vector<1x256xf32>
    %86 = vector.broadcast %84 : vector<8x1xf32> to vector<8x256xf32>
    %87 = vector.broadcast %85 : vector<1x256xf32> to vector<8x256xf32>
    %88 = arith.mulf %86, %87 : vector<8x256xf32>
    %89 = arith.addf %83, %88 : vector<8x256xf32>
    %90 = vector.extract_strided_slice %82 {offsets = [0, 1], sizes = [8, 1], strides = [1, 1]} : vector<8x4xf32> to vector<8x1xf32>
    %91 = vector.extract_strided_slice %81 {offsets = [1, 0], sizes = [1, 256], strides = [1, 1]} : vector<4x256xf32> to vector<1x256xf32>
    %92 = vector.broadcast %90 : vector<8x1xf32> to vector<8x256xf32>
    %93 = vector.broadcast %91 : vector<1x256xf32> to vector<8x256xf32>
    %94 = arith.mulf %92, %93 : vector<8x256xf32>
    %95 = arith.addf %89, %94 : vector<8x256xf32>
    %96 = vector.extract_strided_slice %82 {offsets = [0, 2], sizes = [8, 1], strides = [1, 1]} : vector<8x4xf32> to vector<8x1xf32>
    %97 = vector.extract_strided_slice %81 {offsets = [2, 0], sizes = [1, 256], strides = [1, 1]} : vector<4x256xf32> to vector<1x256xf32>
    %98 = vector.broadcast %96 : vector<8x1xf32> to vector<8x256xf32>
    %99 = vector.broadcast %97 : vector<1x256xf32> to vector<8x256xf32>
    %100 = arith.mulf %98, %99 : vector<8x256xf32>
    %101 = arith.addf %95, %100 : vector<8x256xf32>
    %102 = vector.extract_strided_slice %82 {offsets = [0, 3], sizes = [8, 1], strides = [1, 1]} : vector<8x4xf32> to vector<8x1xf32>
    %103 = vector.extract_strided_slice %81 {offsets = [3, 0], sizes = [1, 256], strides = [1, 1]} : vector<4x256xf32> to vector<1x256xf32>
    %104 = vector.broadcast %102 : vector<8x1xf32> to vector<8x256xf32>
    %105 = vector.broadcast %103 : vector<1x256xf32> to vector<8x256xf32>
    %106 = arith.mulf %104, %105 : vector<8x256xf32>
    %107 = arith.addf %101, %106 : vector<8x256xf32>
    %c0_26 = arith.constant 0 : index
    %c0_27 = arith.constant 0 : index
    %108 = vector.load %arg6[%c0_26, %c0_27] : memref<8x1xf32, #tpu.memory_space<vmem>>, vector<8x1xf32>
    %109 = vector.broadcast %108 : vector<8x1xf32> to vector<8x256xf32>
    %110 = arith.addf %107, %109 : vector<8x256xf32>
    %cst_28 = arith.constant 0.000000e+00 : f32
    %111 = vector.broadcast %cst_28 : f32 to vector<8x256xf32>
    %112 = arith.maximumf %110, %111 : vector<8x256xf32>
    %c0_29 = arith.constant 0 : index
    %c0_30 = arith.constant 0 : index
    %c0_31 = arith.constant 0 : index
    %113 = vector.load %arg7[%c0_29, %c0_30, %c0_31] : memref<1x8x256xf32, #tpu.memory_space<vmem>>, vector<1x8x256xf32>
    %114 = vector.shape_cast %113 : vector<1x8x256xf32> to vector<8x256xf32>
    %115 = vector.shape_cast %112 : vector<8x256xf32> to vector<1x8x256xf32>
    tpu.vector_store %arg7[%c0_29, %c0_30, %c0_31], %115 {strides = array<i32>} : memref<1x8x256xf32, #tpu.memory_space<vmem>>, vector<1x8x256xf32>,
    return
  }
  func.func @transform_0(%arg0: i32) -> (i32, i32, i32) {
    %c0_i32 = arith.constant 0 : i32
    %c0_i32_0 = arith.constant 0 : i32
    %c0_i32_1 = arith.constant 0 : i32
    return %arg0, %c0_i32, %c0_i32_0 : i32, i32, i32
  }
  func.func @transform_1(%arg0: i32) -> (i32, i32) {
    %c0_i32 = arith.constant 0 : i32
    %c0_i32_0 = arith.constant 0 : i32
    %c0_i32_1 = arith.constant 0 : i32
    return %c0_i32, %c0_i32_0 : i32, i32
  }
  func.func @transform_2(%arg0: i32) -> (i32, i32) {
    %c0_i32 = arith.constant 0 : i32
    %c0_i32_0 = arith.constant 0 : i32
    %c0_i32_1 = arith.constant 0 : i32
    return %c0_i32, %c0_i32_0 : i32, i32
  }
  func.func @transform_3(%arg0: i32) -> (i32, i32) {
    %c0_i32 = arith.constant 0 : i32
    %c0_i32_0 = arith.constant 0 : i32
    %c0_i32_1 = arith.constant 0 : i32
    return %c0_i32, %c0_i32_0 : i32, i32
  }
  func.func @transform_4(%arg0: i32) -> (i32, i32) {
    %c0_i32 = arith.constant 0 : i32
    %c0_i32_0 = arith.constant 0 : i32
    %c0_i32_1 = arith.constant 0 : i32
    return %c0_i32, %c0_i32_0 : i32, i32
  }
  func.func @transform_5(%arg0: i32) -> (i32, i32) {
    %c0_i32 = arith.constant 0 : i32
    %c0_i32_0 = arith.constant 0 : i32
    %c0_i32_1 = arith.constant 0 : i32
    return %c0_i32, %c0_i32_0 : i32, i32
  }
  func.func @transform_6(%arg0: i32) -> (i32, i32, i32) {
    %c0_i32 = arith.constant 0 : i32
    %c0_i32_0 = arith.constant 0 : i32
    %c0_i32_1 = arith.constant 0 : i32
    return %arg0, %c0_i32, %c0_i32_0 : i32, i32, i32
  }
}

</mosaic_0001>

<bundles_post_ra>
// kernel: basic_dwconv_pallas.1
= control target key start
LH: loop header
LB: loop body
LE: loop exit
PB: predicated region body
PF: predicated region fallthrough
CT: control target
= control target key end

     0   :  { %s861_s21 = smov 0   ;;  %s1042_s0 = inlined_call_operand.vmem [shape: f32[2,4,256], index: 0, kind: input, shape index: {}]   ;;  %s1043_s1 = inlined_call_operand.vmem [shape: f32[4,9], index: 1, kind: input, shape index: {}]   ;;  %s1044_s2 = inlined_call_operand.vmem [shape: f32[4,1], index: 2, kind: input, shape index: {}]   ;;  %s1045_s3 = inlined_call_operand.vmem [shape: f32[9,256], index: 3, kind: input, shape index: {}]   ;;  %s1046_s4 = inlined_call_operand.vmem [shape: f32[8,4], index: 4, kind: input, shape index: {}]   ;;  %s1047_s5 = inlined_call_operand.vmem [shape: f32[8,1], index: 5, kind: input, shape index: {}]   ;;  %s1048_s6 = inlined_call_operand.vmem [shape: f32[2,8,256], index: 6, kind: output, shape index: {}]  }
   0x1 LB: > { %s743_s22 = sadd.s32 4294967295, %s806_s21   ;;  %p747_p0 = scmp.ge.s32.totalorder %s806_s21, 1  ;;  %s806_s21 = sphi %s861_s21, %s16_s21  }
   0x2   : > { %p212_p1 = scmp.lt.s32.totalorder %s806_s21, 3 }
   0x4   : > { %p213_p2 = pnand %p747_p0, %p212_p1 }
   0x5   : > { %s810_s29 = smov (!%p213_p2), 111   ;;  %s811_s30 = smov (!%p213_p2), 112  }
   0x6   : > { %216 = sbr.rel (%p213_p2) target bundleno = 365 (0x16d), region = 44  ;;  %s813_s7 = smov (!%p213_p2), 127  }
   0x7   : > { %s815_s10 = smov (!%p213_p2), 113   ;;  %s817_s13 = smov (!%p213_p2), 17  }
   0x8   : > { %s818_s14 = smov (!%p213_p2), 1   ;;  %s820_s15 = smov (!%p213_p2), 15  }
   0x9   : > { %s821_s16 = smov (!%p213_p2), 16   ;;  %p242_p3 = scmp.lt.s32.totalorder (!%p213_p2), %s743_s22, 1 }
   0xb   : > { %v872_v0 = vld [vmem:[%s1045_s3] sm:$0xff]  ;;  %v877_v1 = vld [vmem:[%s1045_s3 + $0x8] sm:$0xff]  ;;  %v808_v4 = vmov 1   ;;  %vm258_vm0 = vcmask 1043456   ;;  %v809_v15 = vmov 0   ;;  %v812_v20 = vmov 5  }
   0xc   : > { %v266_v2 = vperm.slane %v872_v0, 0  ;;  %v267_v3 = vperm.slane %v877_v1, 0  ;;  %783 = vset.pattern.permute.xlu1 %v808_v4  ;;  %v885_v5 = vld [vmem:[%s1043_s1] sm:$0xf]  ;;  %v400_v6 = vperm.slane %v877_v1, 3  ;;  %v311_v7 = vperm.slane %v872_v0, 1  ;;  %782 = vset.pattern.permute.xlu0 %v809_v15 }
   0xd   : > { %327 = vperm.xlu1 %783, %v885_v5   ;;  %v312_v8 = vperm.slane %v877_v1, 1  ;;  %v399_v10 = vperm.slane %v872_v0, 3  ;;  %v356_v13 = vperm.slane %v877_v1, 2  ;;  %v355_v18 = vperm.slane %v872_v0, 2  ;;  %787 = vset.pattern.permute.xlu2 %v812_v20  ;;  %v799_v21 = vld [vmem:[%s1045_s3 + $0x18] ss:$0 sm:$0xff] }
   0xe   : > { %v270_v9 = vrot.slane %v267_v3, 4  ;;  %v403_v11 = vrot.slane %v400_v6, 4  ;;  %v814_v22 = vmov 2   ;;  %v459_v24 = vperm.slane %v877_v1, 5  ;;  %v798_v25 = vld [vmem:[%s1045_s3 + $0x10] ss:$0 sm:$0xff] }
   0xf   : > { %v315_v12 = vrot.slane %v312_v8, 4  ;;  %v359_v19 = vrot.slane %v356_v13, 4  ;;  %v588_v26 = vrot.slane %v799_v21, 4  ;;  %vm259_vm1 = vcmask 138244   ;;  %s1050_s22 = smov (!%p242_p3, %s743_s22), 1 }
  0x10   : > { %v271_v14 = vsel %vm258_vm0, %v266_v2, %v270_v9  ;;  %v404_v17 = vsel %vm258_vm0, %v399_v10, %v403_v11  ;;  %v458_v27 = vperm.slane %v872_v0, 5  ;;  %v462_v28 = vrot.slane %v459_v24, 4  ;;  %vm260_vm2 = vmor %vm259_vm1, %vm258_vm0  ;;  %s754_s17 = sshll.u32 %s1050_s22, 3 }
  0x11   : > { %272 = vrot.lane.b32.xlu0 %v271_v14, %s810_s29  ;;  %v316_v16 = vsel %vm258_vm0, %v311_v7, %v315_v12  ;;  %v360_v23 = vsel %vm258_vm0, %v355_v18, %v359_v19  ;;  %v816_v29 = vmov 0.0   ;;  %v589_v30 = vsel %vm258_vm0, %v798_v25, %v588_v26  ;;  %s246_s20 = scalar_lea.vmem %s1042_s0, %s754_s17 }
  0x12   : > { %317 = vrot.lane.b32.xlu2 %v316_v16, %s811_s30  ;;  %257 = vst [vmem:[#allocation2] sm:$0xff] %v816_v29  ;;  %v463_v31 = vsel %vm258_vm0, %v458_v27, %v462_v28  ;;  %v501_v32 = vperm.slane %v877_v1, 6  ;;  %v500_v33 = vperm.slane %v872_v0, 6  ;;  %v819_v35 = vmov 3   ;;  %v940_v41 = vld [vmem:[%s246_s20] sm:$0xff] }
  0x13   : > { %261 = vst.msk [vmem:[#allocation2 + $0x8] sm:$0xff] %vm260_vm2, %v816_v29  ;;  %v543_v37 = vperm.slane %v877_v1, 7  ;;  %v542_v38 = vperm.slane %v872_v0, 7  ;;  %v822_v42 = vmov 7   ;;  %v823_v43 = vmov 4  }
  0x14   : > { %v504_v34 = vrot.slane %v501_v32, 4  ;;  %263 = vst [vmem:[#allocation2 + $0x4] sm:$0xff] %v940_v41  ;;  %v824_v44 = vmov 6   ;;  %vm275_vm3 = vcmask 908288   ;;  %vm320_vm4 = vcmask 916480  }
  0x15   : > { %405 = vrot.lane.b32.xlu1 %v404_v17, %s813_s7  ;;  %v546_v39 = vrot.slane %v543_v37, 4  ;;  %vm364_vm5 = vcmask 924672   ;;  %vm408_vm6 = vcmask 1039360   ;;  %vm432_vm7 = vcmask 7168  }
  0x16   : > { %784 = vset.pattern.permute.xlu1 %v814_v22  ;;  %v505_v36 = vsel %vm258_vm0, %v500_v33, %v504_v34  ;;  %vm388_vm8 = vcmask 121856   ;;  %vm344_vm9 = vcmask 130048   ;;  %vm300_vm10 = vcmask 138240  }
  0x17   : > { %v547_v40 = vsel %vm258_vm0, %v542_v38, %v546_v39 }
  0x19   : > { %283 = vperm.xlu0 %782, %v885_v5  }
  0x1a   : > { %361 = vrot.lane.b32.xlu2 %v360_v23, %s815_s10  ;;  %v457_v20 = vld [vmem:[#allocation2 + $0xc] sm:$0xf] }
  0x1b   : > { %v265_v47 = vld [vmem:[#allocation2 + $0x8] sm:$0xf]  ;;  %v264_v48 = vld [vmem:[#allocation2] sm:$0xff]  ;;  %v499_v28 = vld [vmem:[#allocation2 + $0xc] sm:$0xf] }
  0x1c   : > { %v310_v55 = vld [vmem:[#allocation2 + $0x8] sm:$0xf] }
  0x1d   : > { %371 = vperm.xlu1 %784, %v885_v5   ;;  %v354_v0 = vld [vmem:[#allocation2 + $0x8] sm:$0xf] }
  0x1e   : > { %v398_v11 = vld [vmem:[#allocation2 + $0x8] sm:$0xf] }
  0x21   : > { %590 = vrot.lane.b32.xlu0 %v589_v30, %s817_s13 }
  0x22   : > { %464 = vrot.lane.b32.xlu2 %v463_v31, %s818_s14  ;;  %788 = vset.pattern.permute.xlu0 %v824_v44 }
  0x25   : > { %785 = vset.pattern.permute.xlu1 %v819_v35 }
  0x26   : > { %415 = vperm.xlu1 %785, %v885_v5  }
  0x29   : > { %515 = vperm.xlu0 %788, %v885_v5  }
  0x2a   : > { %506 = vrot.lane.b32.xlu2 %v505_v36, %s820_s15 }
  0x2e   : > { %786 = vset.pattern.permute.xlu1 %v823_v43  ;;  %v825_v43 = vmov 8  }
  0x2f   : > { %443 = vperm.xlu1 %786, %v885_v5  }
  0x31   : > { %790 = vset.pattern.permute.xlu0 %v825_v43 }
  0x32   : > { %548 = vrot.lane.b32.xlu2 %v547_v40, %s821_s16  ;;  %v541_v40 = vld [vmem:[#allocation2 + $0xc] sm:$0xf] }
  0x37   : > { %791 = vset.pattern.permute.xlu1 %v809_v15 }
  0x3a   : > { %473 = vperm.xlu2 %787, %v885_v5  }
  0x42   : > { %789 = vset.pattern.permute.xlu2 %v822_v42 }
  0x43   : > { %557 = vperm.xlu2 %789, %v885_v5  }
  0x4b   : > { %792 = vset.pattern.permute.xlu2 %v809_v15 }
  0x6c   : > { %v318_v45 = vpop.permute.xlu2 %317 }
  0x6d   : > { %v319_v53 = vrot.slane %v318_v45, 4 }
  0x6f   : > { %v321_v56 = vsel %vm320_vm4, %v319_v53, %v318_v45  ;;  %v325_v58 = vmul.f32 %v319_v53, %v310_v55 }
  0x70   : > { %v324_v60 = vmul.f32 %v321_v56, %v264_v48 }
  0x74   : > { %v362_v57 = vpop.permute.xlu2 %361 }
  0x75   : > { %v363_v61 = vrot.slane %v362_v57, 4 }
  0x77   : > { %v365_v1 = vsel %vm364_vm5, %v363_v61, %v362_v57  ;;  %v369_v3 = vmul.f32 %v363_v61, %v354_v0 }
  0x78   : > { %v368_v6 = vmul.f32 %v365_v1, %v264_v48 }
  0x7c   : > { %v465_v13 = vpop.permute.xlu2 %464 }
  0x7d   : > { %v466_v21 = vrot.slane %v465_v13, 4 }
  0x7f   : > { %v949_v54 = vpop.permute.xlu1 %327  ;;  %v471_v23 = vmul.f32 %v466_v21, %v457_v20  ;;  %v467_v29 = vsel %vm432_vm7, %v466_v21, %v465_v13 }
  0x80   : > { %v470_v32 = vmul.f32 %v467_v29, %v940_v41 }
  0x83   : > { %v273_v46 = vpop.permute.xlu0 %272 }
  0x84   : > { %v274_v49 = vrot.slane %v273_v46, 4  ;;  %v507_v24 = vpop.permute.xlu2 %506 }
  0x85   : > { %v508_v30 = vrot.slane %v507_v24, 4 }
  0x86   : > { %v276_v50 = vsel %vm275_vm3, %v274_v49, %v273_v46  ;;  %v280_v51 = vmul.f32 %v274_v49, %v265_v47 }
  0x87   : > { %v279_v52 = vmul.f32 %v276_v50, %v264_v48  ;;  %v406_v2 = vpop.permute.xlu1 %405  ;;  %v513_v31 = vmul.f32 %v508_v30, %v499_v28  ;;  %v509_v42 = vsel %vm388_vm8, %v508_v30, %v507_v24 }
  0x88   : > { %290 = vst [vmem:[#allocation1 + $0x10] ss:$2 sm:$0xff] %v280_v51  ;;  %v407_v7 = vrot.slane %v406_v2, 4  ;;  %v512_v45 = vmul.f32 %v509_v42, %v940_v41  ;;  %v583_v51 = vld [vmem:[#allocation2 + $0xc] sm:$0xf] }
  0x89   : > { %288 = vst [vmem:[#allocation1] ss:$2 sm:$0xff] %v279_v52 }
  0x8a   : > { %v409_v12 = vsel %vm408_vm6, %v407_v7, %v406_v2  ;;  %v413_v14 = vmul.f32 %v407_v7, %v398_v11 }
  0x8b   : > { %v412_v16 = vmul.f32 %v409_v12, %v264_v48  ;;  %v967_v34 = vpop.permute.xlu0 %283 }
  0x8c   : > { %v549_v33 = vpop.permute.xlu2 %548 }
  0x8d   : > { %v550_v39 = vrot.slane %v549_v33, 4 }
  0x8f   : > { %v293_v59 = vld.sshfl [vmem:[#allocation1 + $0x10] sm:$0xff pattern:$0x75316420]  ;;  %v555_v44 = vmul.f32 %v550_v39, %v541_v40  ;;  %v551_v50 = vsel %vm344_vm9, %v550_v39, %v549_v33 }
  0x90   : > { %v291_v62 = vld.sshfl [vmem:[#allocation1] sm:$0xff pattern:$0x75316420]  ;;  %v292_v63 = vld.sshfl [vmem:[#allocation1 + $0x8] sm:$0xff pattern:$0x75316420]  ;;  %298 = vrot.lane.b32.xlu2 %v293_v59, %s817_s13  ;;  %v554_v53 = vmul.f32 %v551_v50, %v940_v41 }
  0x91   : > { %332 = vst [vmem:[#allocation1] ss:$2 sm:$0xff] %v324_v60  ;;  %294 = vrot.lane.b32.xlu1 %v291_v62, %s817_s13 }
  0x92   : > { %334 = vst [vmem:[#allocation1 + $0x10] ss:$2 sm:$0xff] %v325_v58 }
  0x93   : > { %v591_v49 = vpop.permute.xlu0 %590 }
  0x94   : > { %v592_v52 = vrot.slane %v591_v49, 4 }
  0x96   : > { %v597_v55 = vmul.f32 %v592_v52, %v583_v51  ;;  %v593_v59 = vsel %vm300_vm10, %v592_v52, %v591_v49 }
  0x97   : > { %v596_v60 = vmul.f32 %v593_v59, %v940_v41 }
  0x98   : > { %v336_v8 = vld.sshfl [vmem:[#allocation1 + $0x8] sm:$0xff pattern:$0x75316420]  ;;  %v335_v9 = vld.sshfl [vmem:[#allocation1] sm:$0xff pattern:$0x75316420] }
  0x99   : > { %v337_v10 = vld.sshfl [vmem:[#allocation1 + $0x10] sm:$0xff pattern:$0x75316420]  ;;  %296 = vrot.lane.b32.xlu1 %v292_v63, %s817_s13  ;;  %340 = vrot.lane.b32.xlu2 %v336_v8, %s821_s16  ;;  %376 = vst [vmem:[#allocation1] ss:$2 sm:$0xff] %v368_v6  ;;  %v372_v63 = vpop.permute.xlu1 %371 }
  0x9a   : > { %378 = vst [vmem:[#allocation1 + $0x10] ss:$2 sm:$0xff] %v369_v3  ;;  %342 = vrot.lane.b32.xlu0 %v337_v10, %s821_s16  ;;  %v634_v3 = vld [vmem:[%s1046_s4] sm:$0xff]  ;;  %v474_v10 = vpop.permute.xlu2 %473 }
  0xa0   : > { %v380_v17 = vld.sshfl [vmem:[#allocation1 + $0x8] sm:$0xff pattern:$0x75316420]  ;;  %v379_v18 = vld.sshfl [vmem:[#allocation1] sm:$0xff pattern:$0x75316420] }
  0xa1   : > { %384 = vrot.lane.b32.xlu1 %v380_v17, %s820_s15  ;;  %420 = vst [vmem:[#allocation1] ss:$2 sm:$0xff] %v412_v16  ;;  %v381_v19 = vld.sshfl [vmem:[#allocation1 + $0x10] sm:$0xff pattern:$0x75316420]  ;;  %v988_v2 = vpop.permute.xlu1 %415 }
  0xa2   : > { %338 = vrot.lane.b32.xlu0 %v335_v9, %s821_s16  ;;  %422 = vst [vmem:[#allocation1 + $0x10] ss:$2 sm:$0xff] %v413_v14  ;;  %v624_v9 = vld [vmem:[%s1044_s2] sm:$0xf]  ;;  %v1008_v11 = vpop.permute.xlu2 %557 }
  0xa8   : > { %v424_v25 = vld.sshfl [vmem:[#allocation1 + $0x8] sm:$0xff pattern:$0x75316420]  ;;  %v423_v26 = vld.sshfl [vmem:[#allocation1] sm:$0xff pattern:$0x75316420] }
  0xa9   : > { %v425_v27 = vld.sshfl [vmem:[#allocation1 + $0x10] sm:$0xff pattern:$0x75316420]  ;;  %428 = vrot.lane.b32.xlu2 %v424_v25, %s818_s14  ;;  %426 = vrot.lane.b32.xlu1 %v423_v26, %s818_s14  ;;  %447 = vst [vmem:[#allocation1] ss:$2 sm:$0xff] %v940_v41  ;;  %v444_v6 = vpop.permute.xlu1 %443 }
  0xaa   : > { %480 = vst [vmem:[#allocation1 + $0x10] ss:$2 sm:$0xff] %v471_v23  ;;  %386 = vrot.lane.b32.xlu0 %v381_v19, %s820_s15 }
  0xb0   : > { %v448_v36 = vld.sshfl [vmem:[#allocation1] sm:$0xff pattern:$0x75316420]  ;;  %v449_v37 = vld.sshfl [vmem:[#allocation1 + $0x8] sm:$0xff pattern:$0x75316420] }
  0xb1   : > { %478 = vst [vmem:[#allocation1] ss:$2 sm:$0xff] %v470_v32  ;;  %v483_v38 = vld.sshfl [vmem:[#allocation1 + $0x10] sm:$0xff pattern:$0x75316420]  ;;  %v995_v7 = vmul.f32 %v448_v36, %v444_v6  ;;  %v453_v8 = vmul.f32 %v449_v37, %v444_v6 }
  0xb2   : > { %382 = vrot.lane.b32.xlu0 %v379_v18, %s820_s15  ;;  %522 = vst [vmem:[#allocation1 + $0x10] ss:$2 sm:$0xff] %v513_v31  ;;  %488 = vrot.lane.b32.xlu2 %v483_v38, %s813_s7 }
  0xb8   : > { %v482_v46 = vld.sshfl [vmem:[#allocation1 + $0x8] sm:$0xff pattern:$0x75316420]  ;;  %v481_v47 = vld.sshfl [vmem:[#allocation1] sm:$0xff pattern:$0x75316420] }
  0xb9   : > { %v525_v48 = vld.sshfl [vmem:[#allocation1 + $0x10] sm:$0xff pattern:$0x75316420]  ;;  %520 = vst [vmem:[#allocation1] ss:$2 sm:$0xff] %v512_v45 }
  0xba   : > { %430 = vrot.lane.b32.xlu0 %v425_v27, %s818_s14  ;;  %564 = vst [vmem:[#allocation1 + $0x10] ss:$2 sm:$0xff] %v555_v44  ;;  %530 = vrot.lane.b32.xlu1 %v525_v48, %s815_s10 }
  0xc0   : > { %v524_v56 = vld.sshfl [vmem:[#allocation1 + $0x8] sm:$0xff pattern:$0x75316420]  ;;  %v523_v57 = vld.sshfl [vmem:[#allocation1] sm:$0xff pattern:$0x75316420] }
  0xc1   : > { %v567_v58 = vld.sshfl [vmem:[#allocation1 + $0x10] sm:$0xff pattern:$0x75316420]  ;;  %562 = vst [vmem:[#allocation1] ss:$2 sm:$0xff] %v554_v53 }
  0xc2   : > { %572 = vrot.lane.b32.xlu2 %v567_v58, %s811_s30  ;;  %486 = vrot.lane.b32.xlu1 %v482_v46, %s813_s7  ;;  %606 = vst [vmem:[#allocation1 + $0x10] ss:$2 sm:$0xff] %v597_v55 }
  0xc3   : > { %484 = vrot.lane.b32.xlu0 %v481_v47, %s813_s7 }
  0xc8   : > { %v565_v61 = vld.sshfl [vmem:[#allocation1] sm:$0xff pattern:$0x75316420]  ;;  %v566_v62 = vld.sshfl [vmem:[#allocation1 + $0x8] sm:$0xff pattern:$0x75316420] }
  0xc9   : > { %604 = vst [vmem:[#allocation1] ss:$2 sm:$0xff] %v596_v60  ;;  %v609_v0 = vld.sshfl [vmem:[#allocation1 + $0x10] sm:$0xff pattern:$0x75316420] }
  0xca   : > { %528 = vrot.lane.b32.xlu2 %v524_v56, %s815_s10  ;;  %526 = vrot.lane.b32.xlu1 %v523_v57, %s815_s10 }
  0xcb   : > { %568 = vrot.lane.b32.xlu0 %v565_v61, %s811_s30 }
  0xd0   : > { %v607_v1 = vld.sshfl [vmem:[#allocation1] sm:$0xff pattern:$0x75316420]  ;;  %v608_v41 = vld.sshfl [vmem:[#allocation1 + $0x8] sm:$0xff pattern:$0x75316420] }
  0xd2   : > { %570 = vrot.lane.b32.xlu1 %v566_v62, %s811_s30  ;;  %614 = vrot.lane.b32.xlu2 %v609_v0, %s810_s29 }
  0xd3   : > { %610 = vrot.lane.b32.xlu0 %v607_v1, %s810_s29 }
  0xda   : > { %612 = vrot.lane.b32.xlu1 %v608_v41, %s810_s29  ;;  %637 = vperm.xlu2 %792, %v634_v3   ;;  %s755_s29 = sshll.u32 %s1050_s22, 4 }
  0xdb   : > { %599 = vperm.xlu0 %790, %v885_v5   ;;  %v676_v5 = vld [vmem:[%s1047_s5] sm:$0xff]  ;;  %s251_s8 = scalar_lea.vmem %s1048_s6, %s755_s29 }
  0xe2   : > { %627 = vperm.xlu1 %791, %v624_v9   ;;  %794 = vset.pattern.permute.xlu2 %v814_v22  ;;  %v516_v22 = vpop.permute.xlu0 %515 }
  0xe3   : > { %795 = vset.pattern.permute.xlu0 %v819_v35  ;;  %657 = vperm.xlu2 %794, %v634_v3  }
  0xe4   : > { %667 = vperm.xlu0 %795, %v634_v3  }
  0xea   : > { %793 = vset.pattern.permute.xlu1 %v808_v4  ;;  %v299_v12 = vpop.permute.xlu2 %298 }
  0xeb   : > { %647 = vperm.xlu1 %793, %v634_v3  }
  0xec   : > { %797 = vset.pattern.permute.xlu0 %v809_v15 }
  0xf3   : > { %796 = vset.pattern.permute.xlu1 %v809_v15  ;;  %v341_v14 = vpop.permute.xlu2 %340 }
  0xf4   : > { %679 = vperm.xlu1 %796, %v676_v5  }
 0x103   : > { %v295_v35 = vpop.permute.xlu1 %294  ;;  %v429_v17 = vpop.permute.xlu2 %428 }
 0x10b   : > { %v297_v16 = vpop.permute.xlu1 %296 }
 0x10c   : > { %v343_v13 = vpop.permute.xlu0 %342  ;;  %v489_v20 = vpop.permute.xlu2 %488  ;;  %v302_v15 = vsel %vm300_vm10, %v297_v16, %v299_v12  ;;  %v301_v33 = vsel %vm300_vm10, %v295_v35, %v297_v16 }
 0x10d   : > { %v346_v24 = vsel %vm344_vm9, %v341_v14, %v343_v13  ;;  %v306_v27 = vmul.f32 %v302_v15, %v967_v34  ;;  %v305_v42 = vmul.f32 %v301_v33, %v967_v34 }
 0x10e   : > { %v350_v26 = vmul.f32 %v346_v24, %v949_v54 }
 0x110   : > { %v352_v38 = vadd.f32 %v350_v26, %v306_v27 }
 0x113   : > { %v385_v18 = vpop.permute.xlu1 %384 }
 0x114   : > { %v339_v4 = vpop.permute.xlu0 %338 }
 0x115   : > { %v345_v29 = vsel %vm344_vm9, %v339_v4, %v341_v14 }
 0x116   : > { %v349_v39 = vmul.f32 %v345_v29, %v949_v54 }
 0x118   : > { %v351_v45 = vadd.f32 %v349_v39, %v305_v42 }
 0x11b   : > { %v427_v21 = vpop.permute.xlu1 %426 }
 0x11c   : > { %v387_v19 = vpop.permute.xlu0 %386  ;;  %v573_v28 = vpop.permute.xlu2 %572  ;;  %v433_v47 = vsel %vm432_vm7, %v427_v21, %v429_v17 }
 0x11d   : > { %v390_v25 = vsel %vm388_vm8, %v385_v18, %v387_v19  ;;  %v437_v54 = vmul.f32 %v433_v47, %v988_v2 }
 0x11e   : > { %v394_v30 = vmul.f32 %v390_v25, %v372_v63 }
 0x120   : > { %v396_v43 = vadd.f32 %v394_v30, %v352_v38 }
 0x124   : > { %v383_v23 = vpop.permute.xlu0 %382  ;;  %v529_v49 = vpop.permute.xlu2 %528 }
 0x125   : > { %v389_v36 = vsel %vm388_vm8, %v383_v23, %v385_v18 }
 0x126   : > { %v393_v44 = vmul.f32 %v389_v36, %v372_v63 }
 0x128   : > { %v395_v48 = vadd.f32 %v393_v44, %v351_v45 }
 0x12a   : > { %v439_v57 = vadd.f32 %v437_v54, %v395_v48 }
 0x12c   : > { %v431_v31 = vpop.permute.xlu0 %430  ;;  %v531_v32 = vpop.permute.xlu1 %530  ;;  %v454_v62 = vadd.f32 %v995_v7, %v439_v57 }
 0x12d   : > { %v434_v37 = vsel %vm432_vm7, %v429_v17, %v431_v31  ;;  %v533_v51 = vsel %vm364_vm5, %v529_v49, %v531_v32  ;;  %v615_v12 = vpop.permute.xlu2 %614 }
 0x12e   : > { %v438_v40 = vmul.f32 %v434_v37, %v988_v2  ;;  %v537_v58 = vmul.f32 %v533_v51, %v516_v22 }
 0x130   : > { %v440_v46 = vadd.f32 %v438_v40, %v396_v43 }
 0x132   : > { %v455_v55 = vadd.f32 %v453_v8, %v440_v46 }
 0x134   : > { %v487_v50 = vpop.permute.xlu1 %486 }
 0x135   : > { %v491_v52 = vsel %vm408_vm6, %v487_v50, %v489_v20  ;;  %v485_v53 = vpop.permute.xlu0 %484  ;;  %v638_v19 = vpop.permute.xlu2 %637 }
 0x136   : > { %v495_v56 = vmul.f32 %v491_v52, %v474_v10  ;;  %v490_v34 = vsel %vm408_vm6, %v485_v53, %v487_v50 }
 0x137   : > { %v494_v60 = vmul.f32 %v490_v34, %v474_v10 }
 0x138   : > { %v497_v59 = vadd.f32 %v495_v56, %v455_v55 }
 0x139   : > { %v496_v41 = vadd.f32 %v494_v60, %v454_v62 }
 0x13a   : > { %v539_v61 = vadd.f32 %v537_v58, %v497_v59 }
 0x13c   : > { %v527_v63 = vpop.permute.xlu1 %526 }
 0x13d   : > { %v532_v0 = vsel %vm364_vm5, %v527_v63, %v529_v49  ;;  %v569_v1 = vpop.permute.xlu0 %568  ;;  %v658_v32 = vpop.permute.xlu2 %657 }
 0x13e   : > { %v536_v3 = vmul.f32 %v532_v0, %v516_v22 }
 0x140   : > { %v538_v6 = vadd.f32 %v536_v3, %v496_v41 }
 0x144   : > { %v571_v9 = vpop.permute.xlu1 %570 }
 0x145   : > { %v611_v2 = vpop.permute.xlu0 %610  ;;  %v574_v8 = vsel %vm320_vm4, %v569_v1, %v571_v9  ;;  %v575_v5 = vsel %vm320_vm4, %v571_v9, %v573_v28 }
 0x146   : > { %v578_v10 = vmul.f32 %v574_v8, %v1008_v11  ;;  %v579_v13 = vmul.f32 %v575_v5, %v1008_v11 }
 0x148   : > { %v580_v17 = vadd.f32 %v578_v10, %v538_v6  ;;  %v581_v18 = vadd.f32 %v579_v13, %v539_v61 }
 0x14c   : > { %v613_v35 = vpop.permute.xlu1 %612 }
 0x14d   : > { %v616_v7 = vsel %vm275_vm3, %v611_v2, %v613_v35  ;;  %v617_v14 = vsel %vm275_vm3, %v613_v35, %v615_v12  ;;  %v600_v16 = vpop.permute.xlu0 %599 }
 0x14e   : > { %v620_v4 = vmul.f32 %v616_v7, %v600_v16  ;;  %v621_v22 = vmul.f32 %v617_v14, %v600_v16 }
 0x150   : > { %v622_v20 = vadd.f32 %v620_v4, %v580_v17  ;;  %v623_v21 = vadd.f32 %v621_v22, %v581_v18 }
 0x154   : > { %v628_v23 = vpop.permute.xlu1 %627 }
 0x155   : > { %v630_v24 = vadd.f32 %v628_v23, %v622_v20  ;;  %v631_v15 = vadd.f32 %v628_v23, %v623_v21 }
 0x156   : > { %v668_v43 = vpop.permute.xlu0 %667 }
 0x157   : > { %v632_v25 = vmax.f32 %v630_v24, 0.0  ;;  %v633_v26 = vmax.f32 %v631_v15, 0.0 }
 0x159   : > { %v640_v27 = vperm.slane %v632_v25, 0  ;;  %v641_v28 = vperm.slane %v633_v26, 0  ;;  %v660_v11 = vperm.slane %v632_v25, 2  ;;  %v661_v29 = vperm.slane %v633_v26, 2 }
 0x15a   : > { %v650_v30 = vperm.slane %v632_v25, 1  ;;  %v651_v31 = vperm.slane %v633_v26, 1  ;;  %v671_v33 = vperm.slane %v633_v26, 3  ;;  %v670_v36 = vperm.slane %v632_v25, 3 }
 0x15b   : > { %v642_v38 = vmul.f32 %v640_v27, %v638_v19  ;;  %v643_v39 = vmul.f32 %v641_v28, %v638_v19  ;;  %v662_v44 = vmul.f32 %v660_v11, %v658_v32  ;;  %v663_v45 = vmul.f32 %v661_v29, %v658_v32 }
 0x15c   : > { %v672_v48 = vmul.f32 %v670_v36, %v668_v43  ;;  %v673_v49 = vmul.f32 %v671_v33, %v668_v43 }
 0x15d   : > { %v648_v37 = vpop.permute.xlu1 %647 }
 0x15e   : > { %v652_v40 = vmul.f32 %v650_v30, %v648_v37  ;;  %v653_v42 = vmul.f32 %v651_v31, %v648_v37 }
 0x160   : > { %v654_v46 = vadd.f32 %v652_v40, %v642_v38  ;;  %v655_v47 = vadd.f32 %v653_v42, %v643_v39 }
 0x162   : > { %v664_v50 = vadd.f32 %v662_v44, %v654_v46  ;;  %v665_v51 = vadd.f32 %v663_v45, %v655_v47 }
 0x164   : > { %v674_v52 = vadd.f32 %v672_v48, %v664_v50  ;;  %v675_v53 = vadd.f32 %v673_v49, %v665_v51 }
 0x166   : > { %v680_v54 = vpop.permute.xlu1 %679 }
 0x167   : > { %v682_v55 = vadd.f32 %v680_v54, %v674_v52  ;;  %v683_v56 = vadd.f32 %v680_v54, %v675_v53 }
 0x169   : > { %v684_v34 = vmax.f32 %v682_v55, 0.0  ;;  %v685_v57 = vmax.f32 %v683_v56, 0.0 }
 0x16b   : > { %686 = vst [vmem:[%s251_s8] sm:$0xff] %v684_v34 }
 0x16c   : > { %687 = vst [vmem:[%s251_s8 + $0x8] sm:$0xff] %v685_v57 }
 0x16d PF: > { %s16_s21 = sadd.s32 1, %s806_s21  }
 0x16e   : > { %p13_p4 = scmp.ge.s32.totalorder %s16_s21, 4  }
 0x170   :  { %15 = sbr.rel (!%p13_p4) target bundleno = 1 (0x1), region = 82 }

</bundles_post_ra>
